<compile_context>
chip_gen: v7x
topology: tpu7x:2x2x1
jax: 0.10.0
libtpu: 0.0.40
codegen_flags: <defaults>
</compile_context>

<pallas_src>
import functools

import jax
import jax.numpy as jnp
from jax.experimental import pallas as pl
from jax.experimental.pallas import tpu as pltpu


_TM = 512          # row (sublane) tile target
_TN = 256          # output-feature (lane) tile target
_TK = 256          # reduction tile target
_TKV = 512         # flash-attention KV tile target


def _detect_vmem_limit():
    """Generation-aware scoped-VMEM limit (v5e/v6e: 128 MiB, v7x: 64 MiB)."""
    cap = 64 * 1024 * 1024
    try:
        info = pltpu.get_tpu_info()
        c = getattr(info, "vmem_capacity_bytes", None)
        if c:
            cap = int(c)
    except Exception:
        pass
    return max(32 * 1024 * 1024, min(cap * 3 // 4, 112 * 1024 * 1024))


_VMEM_LIMIT = _detect_vmem_limit()


def _tile(n, target, align):
    """Largest tile <= target that divides n and respects TPU alignment.

    Falls back to the full extent (always legal for BlockSpec) if no aligned
    divisor exists.  Note: non-128-multiple model dims (e.g. SD dim=320) fall
    back to full extent -> masked tail stores; pad weights host-side to the
    next multiple of 128 if that matters for your shapes.
    """
    if n <= target:
        return n
    t = target
    while t >= align:
        if n % t == 0 and t % align == 0:
            return t
        t //= 2
    return n


def _params(semantics):
    return pltpu.CompilerParams(dimension_semantics=semantics,
                                vmem_limit_bytes=_VMEM_LIMIT)


# ----------------------------- Pallas kernels ------------------------------

def _layernorm_f32(x, g, b):
    mu = jnp.mean(x, axis=-1, keepdims=True)
    var = jnp.mean(jnp.square(x - mu), axis=-1, keepdims=True)
    return (x - mu) * jax.lax.rsqrt(var + 1e-5) * g + b


def _proj_kernel(*refs, nproj, apply_ln, scales, compute_dtype):
    """y_i = (LN(x) if apply_ln else x) @ W_i [* scales_i]  for i < nproj.

    refs = [x, (gamma, beta)?, W_0..W_{nproj-1}, O_0..O_{nproj-1}, (ln_scr)?]
    All projections share one x tile read; LayerNorm is computed once per row
    tile (at j == 0) into a VMEM scratch and reused for every j output tile.
    """
    if apply_ln:
        x_ref, g_ref, b_ref = refs[0], refs[1], refs[2]
        w_refs = refs[3:3 + nproj]
        o_refs = refs[3 + nproj:3 + 2 * nproj]
        ln_ref = refs[3 + 2 * nproj]

        @pl.when(pl.program_id(1) == 0)
        def _():
            xs = x_ref[...].astype(jnp.float32)
            ln_ref[...] = _layernorm_f32(
                xs, g_ref[...].astype(jnp.float32),
                b_ref[...].astype(jnp.float32)).astype(ln_ref.dtype)

        xc = ln_ref[...]
    else:
        x_ref = refs[0]
        w_refs = refs[1:1 + nproj]
        o_refs = refs[1 + nproj:1 + 2 * nproj]
        xc = x_ref[...]
        if xc.dtype != compute_dtype:
            xc = xc.astype(compute_dtype)

    for w_ref, o_ref, s in zip(w_refs, o_refs, scales):
        y = jnp.dot(xc, w_ref[...], preferred_element_type=jnp.float32)
        if s is not None:
            y = y * s
        o_ref[...] = y.astype(o_ref.dtype)


def _ln_geglu_kernel(x_ref, g_ref, b_ref, wv_ref, bv_ref, wg_ref, bg_ref,
                     o_ref, ln_ref):
    """out = (LN(x) @ W_val + b_val) * gelu(LN(x) @ W_gate + b_gate).

    LN cached in a VMEM scratch across the j (output-feature) grid axis.
    """
    @pl.when(pl.program_id(1) == 0)
    def _():
        xs = x_ref[...].astype(jnp.float32)
        ln_ref[...] = _layernorm_f32(
            xs, g_ref[...].astype(jnp.float32),
            b_ref[...].astype(jnp.float32)).astype(ln_ref.dtype)

    xc = ln_ref[...]
    val = (jnp.dot(xc, wv_ref[...], preferred_element_type=jnp.float32)
           + bv_ref[...].astype(jnp.float32))
    gate = (jnp.dot(xc, wg_ref[...], preferred_element_type=jnp.float32)
            + bg_ref[...].astype(jnp.float32))
    # exact (erf-based) GELU matches torch F.gelu default
    o_ref[...] = (val * jax.nn.gelu(gate, approximate=False)).astype(o_ref.dtype)


def _matmul_bias_res_single_kernel(x_ref, w_ref, b_ref, r_ref, o_ref):
    """o = x @ W + b + residual  (single K step -> no accumulator scratch)."""
    y = jnp.dot(x_ref[...], w_ref[...], preferred_element_type=jnp.float32)
    o_ref[...] = (y + b_ref[...].astype(jnp.float32)
                  + r_ref[...].astype(jnp.float32)).astype(o_ref.dtype)


def _matmul_bias_res_kernel(x_ref, w_ref, b_ref, r_ref, o_ref, acc_ref):
    """o = x @ W + b + residual, with a K-reduction grid axis (last axis)."""
    k = pl.program_id(2)

    @pl.when(k == 0)
    def _():
        acc_ref[...] = jnp.zeros_like(acc_ref)

    acc_ref[...] += jnp.dot(x_ref[...], w_ref[...],
                            preferred_element_type=jnp.float32)

    @pl.when(k == pl.num_programs(2) - 1)
    def _():
        o_ref[...] = (acc_ref[...]
                      + b_ref[...].astype(jnp.float32)
                      + r_ref[...].astype(jnp.float32)).astype(o_ref.dtype)


def _flash_attn_kernel(q_ref, k_ref, v_ref, o_ref, m_sc, l_sc, acc_sc, *, heads):
    """Flash-style attention over a KV grid axis.

    Blocks carry all heads packed in the lane dim ('b n (h d)' layout), so
    DMAs are lane-dense and the output needs no wrapper-side transpose.
    Per-head QK^T / PV matmuls are statically unrolled, but the running
    accumulator is updated with ONE full-width lane-dense store per KV step
    (per-head alpha/inv are lane-broadcast and concatenated to full width).
    The softmax scale is already folded into q by the projection kernel.
    """
    kv = pl.program_id(2)

    @pl.when(kv == 0)
    def _():
        m_sc[...] = jnp.full_like(m_sc, -jnp.inf)
        l_sc[...] = jnp.zeros_like(l_sc)
        acc_sc[...] = jnp.zeros_like(acc_sc)

    q = q_ref[0]                       # (tq,  heads*d)  compute dtype (scaled)
    k = k_ref[0]                       # (tkv, heads*d)
    v = v_ref[0]                       # (tkv, heads*d)
    tq, inner = q.shape
    d = inner // heads

    m_prev = m_sc[...]                 # (tq, heads) f32
    l_prev = l_sc[...]

    # per-head scores and new running max
    s_h, m_cols = [], []
    for h in range(heads):
        sl = slice(h * d, (h + 1) * d)
        s = jax.lax.dot_general(q[:, sl], k[:, sl],
                                (((1,), (1,)), ((), ())),
                                preferred_element_type=jnp.float32)   # (tq,tkv)
        s_h.append(s)
        m_cols.append(jnp.maximum(m_prev[:, h:h + 1],
                                  jnp.max(s, axis=-1, keepdims=True)))
    m_new = jnp.concatenate(m_cols, axis=-1)          # (tq, heads)
    alpha = jnp.exp(m_prev - m_new)                   # (tq, heads)

    # per-head probs / PV, assembled into full-width pieces
    pv_cols, l_cols, a_cols = [], [], []
    for h in range(heads):
        p = jnp.exp(s_h[h] - m_new[:, h:h + 1])       # (tq, tkv) f32
        l_cols.append(jnp.sum(p, axis=-1, keepdims=True))
        pv_cols.append(jnp.dot(p.astype(v.dtype), v[:, h * d:(h + 1) * d],
                               preferred_element_type=jnp.float32))
        a_cols.append(jnp.broadcast_to(alpha[:, h:h + 1], (tq, d)))
    pv = jnp.concatenate(pv_cols, axis=-1)            # (tq, heads*d)
    alpha_full = jnp.concatenate(a_cols, axis=-1)     # (tq, heads*d)

    m_sc[...] = m_new
    l_sc[...] = alpha * l_prev + jnp.concatenate(l_cols, axis=-1)
    acc_sc[...] = alpha_full * acc_sc[...] + pv       # single full-width update

    @pl.when(kv == pl.num_programs(2) - 1)
    def _():
        inv = pl.reciprocal(l_sc[...], approx=True)   # (tq, heads)
        inv_full = jnp.concatenate(
            [jnp.broadcast_to(inv[:, h:h + 1], (tq, d)) for h in range(heads)],
            axis=-1)
        o_ref[0] = (acc_sc[...] * inv_full).astype(o_ref.dtype)


# ----------------------------- wrappers -------------------------------------

def fused_projections(x2, ws, *, ln=None, scales=None,
                      compute_dtype=jnp.bfloat16):
    """Shared-input projections: y_i = (LN(x2) if ln else x2) @ ws[i]."""
    rows, cin = x2.shape
    nout = ws[0].shape[1]
    nproj = len(ws)
    if scales is None:
        scales = (None,) * nproj
    tm = _tile(rows, _TM, 16)
    tn = _tile(nout, _TN, 128)
    grid = (rows // tm, nout // tn)

    in_specs = [pl.BlockSpec((tm, cin), lambda i, j: (i, 0))]
    inputs = [x2]
    scratch = []
    if ln is not None:
        g, b = ln
        in_specs += [pl.BlockSpec((1, cin), lambda i, j: (0, 0))] * 2
        inputs += [g.reshape(1, cin), b.reshape(1, cin)]
        scratch = [pltpu.VMEM((tm, cin), compute_dtype)]   # cached LN(x) tile
    in_specs += [pl.BlockSpec((cin, tn), lambda i, j: (0, j)) for _ in ws]
    inputs += list(ws)

    kernel = functools.partial(_proj_kernel, nproj=nproj,
                               apply_ln=ln is not None, scales=tuple(scales),
                               compute_dtype=compute_dtype)
    outs = pl.pallas_call(
        kernel,
        grid=grid,
        in_specs=in_specs,
        out_specs=tuple(pl.BlockSpec((tm, tn), lambda i, j: (i, j)) for _ in ws),
        out_shape=tuple(jax.ShapeDtypeStruct((rows, nout), compute_dtype)
                        for _ in ws),
        scratch_shapes=scratch,
        # j must stay within one core and in-order for the LN scratch reuse.
        compiler_params=_params(("parallel", "arbitrary")),
    )(*inputs)
    if not isinstance(outs, (tuple, list)):
        outs = (outs,)
    return tuple(outs)


def ln_geglu(x2, gamma, beta, w_val, b_val, w_gate, b_gate, *,
             compute_dtype=jnp.bfloat16):
    rows, cin = x2.shape
    nout = w_val.shape[1]
    tm = _tile(rows, _TM, 16)
    tn = _tile(nout, _TN, 128)
    grid = (rows // tm, nout // tn)
    return pl.pallas_call(
        _ln_geglu_kernel,
        grid=grid,
        in_specs=[
            pl.BlockSpec((tm, cin), lambda i, j: (i, 0)),
            pl.BlockSpec((1, cin), lambda i, j: (0, 0)),
            pl.BlockSpec((1, cin), lambda i, j: (0, 0)),
            pl.BlockSpec((cin, tn), lambda i, j: (0, j)),
            pl.BlockSpec((1, tn), lambda i, j: (0, j)),
            pl.BlockSpec((cin, tn), lambda i, j: (0, j)),
            pl.BlockSpec((1, tn), lambda i, j: (0, j)),
        ],
        out_specs=pl.BlockSpec((tm, tn), lambda i, j: (i, j)),
        out_shape=jax.ShapeDtypeStruct((rows, nout), compute_dtype),
        scratch_shapes=[pltpu.VMEM((tm, cin), compute_dtype)],
        compiler_params=_params(("parallel", "arbitrary")),
    )(x2, gamma.reshape(1, -1), beta.reshape(1, -1),
      w_val, b_val.reshape(1, -1), w_gate, b_gate.reshape(1, -1))


def matmul_bias_residual(x2, w, b, res):
    rows, kdim = x2.shape
    nout = w.shape[1]
    tm = _tile(rows, _TM, 16)
    tn = _tile(nout, _TN, 128)
    tk = _tile(kdim, _TK, 128)
    out_dtype = res.dtype

    if tk == kdim:
        # Single reduction step: no f32 scratch, no zero-init round trip.
        grid = (rows // tm, nout // tn)
        return pl.pallas_call(
            _matmul_bias_res_single_kernel,
            grid=grid,
            in_specs=[
                pl.BlockSpec((tm, kdim), lambda i, j: (i, 0)),
                pl.BlockSpec((kdim, tn), lambda i, j: (0, j)),
                pl.BlockSpec((1, tn), lambda i, j: (0, j)),
                pl.BlockSpec((tm, tn), lambda i, j: (i, j)),
            ],
            out_specs=pl.BlockSpec((tm, tn), lambda i, j: (i, j)),
            out_shape=jax.ShapeDtypeStruct((rows, nout), out_dtype),
            compiler_params=_params(("parallel", "parallel")),
        )(x2, w, b.reshape(1, -1), res)

    grid = (rows // tm, nout // tn, kdim // tk)
    return pl.pallas_call(
        _matmul_bias_res_kernel,
        grid=grid,
        in_specs=[
            pl.BlockSpec((tm, tk), lambda i, j, k: (i, k)),
            pl.BlockSpec((tk, tn), lambda i, j, k: (k, j)),
            pl.BlockSpec((1, tn), lambda i, j, k: (0, j)),
            pl.BlockSpec((tm, tn), lambda i, j, k: (i, j)),
        ],
        out_specs=pl.BlockSpec((tm, tn), lambda i, j, k: (i, j)),
        out_shape=jax.ShapeDtypeStruct((rows, nout), out_dtype),
        scratch_shapes=[pltpu.VMEM((tm, tn), jnp.float32)],
        compiler_params=_params(("parallel", "parallel", "arbitrary")),
    )(x2, w, b.reshape(1, -1), res)


def flash_attention(q, k, v, heads):
    B, N, inner = q.shape
    M = k.shape[1]
    tq = _tile(N, _TM, 16)
    tkv = _tile(M, _TKV, 16)
    grid = (B, N // tq, M // tkv)
    kernel = functools.partial(_flash_attn_kernel, heads=heads)
    return pl.pallas_call(
        kernel,
        grid=grid,
        in_specs=[
            pl.BlockSpec((1, tq, inner), lambda b, qi, ki: (b, qi, 0)),
            pl.BlockSpec((1, tkv, inner), lambda b, qi, ki: (b, ki, 0)),
            pl.BlockSpec((1, tkv, inner), lambda b, qi, ki: (b, ki, 0)),
        ],
        out_specs=pl.BlockSpec((1, tq, inner), lambda b, qi, ki: (b, qi, 0)),
        out_shape=jax.ShapeDtypeStruct((B, N, inner), q.dtype),
        scratch_shapes=[
            pltpu.VMEM((tq, heads), jnp.float32),   # running max per head
            pltpu.VMEM((tq, heads), jnp.float32),   # running denom per head
            pltpu.VMEM((tq, inner), jnp.float32),   # running output (f32 acc)
        ],
        compiler_params=_params(("parallel", "parallel", "arbitrary")),
    )(q, k, v)


def cross_attention_block(x2, ln_g, ln_b, ctx2, p, heads, B, N, M, cdt):
    """x2 <- to_out(attention(LN(x2), context)) + x2   (rows = B*N)."""
    inner = p["wq"].shape[1]
    d = inner // heads
    scale = d ** (-0.5)
    if ctx2 is None:
        # Self-attention: q, k, v all come from LN(x) -> one fused kernel
        # sharing the x read and the LayerNorm.  Scale folded into q.
        q2, k2, v2 = fused_projections(
            x2, (p["wq"], p["wk"], p["wv"]),
            ln=(ln_g, ln_b), scales=(scale, None, None), compute_dtype=cdt)
        m_rows = N
    else:
        (q2,) = fused_projections(x2, (p["wq"],), ln=(ln_g, ln_b),
                                  scales=(scale,), compute_dtype=cdt)
        k2, v2 = fused_projections(ctx2, (p["wk"], p["wv"]), compute_dtype=cdt)
        m_rows = M
    q = q2.reshape(B, N, inner)
    k = k2.reshape(B, m_rows, inner)
    v = v2.reshape(B, m_rows, inner)
    o = flash_attention(q, k, v, heads).reshape(B * N, inner)
    # to_out = Linear + Dropout(0.0); residual fused into the same kernel.
    return matmul_bias_residual(o, p["wo"], p["bo"], x2)


def basic_transformer_block(x, context, params, heads,
                            compute_dtype=jnp.bfloat16):
    B, N, C = x.shape
    x2 = x.reshape(B * N, C)            # residual stream stays f32
    cdt = compute_dtype

    def cast_attn(p):
        return {"wq": p["wq"].astype(cdt), "wk": p["wk"].astype(cdt),
                "wv": p["wv"].astype(cdt), "wo": p["wo"].astype(cdt),
                "bo": p["bo"]}

    a1 = cast_attn(params["attn1"])
    a2 = cast_attn(params["attn2"])

    # --- self-attention + residual ---
    x2 = cross_attention_block(x2, params["ln1_g"], params["ln1_b"], None,
                               a1, heads, B, N, N, cdt)

    # --- cross-attention + residual ---
    if context is None:
        ctx2, M = None, N
    else:
        Bc, M, Cc = context.shape
        ctx2 = context.reshape(Bc * M, Cc)
    x2 = cross_attention_block(x2, params["ln2_g"], params["ln2_b"], ctx2,
                               a2, heads, B, N, M, cdt)

    # --- feed-forward (GEGLU) + residual ---
    ffp = params["ff"]
    ff_inner = ffp["w2"].shape[0]
    # split proj weight once on the host side so the kernel never slices h
    w_val = ffp["w1"][:, :ff_inner].astype(cdt)
    w_gate = ffp["w1"][:, ff_inner:].astype(cdt)
    b_val, b_gate = ffp["b1"][:ff_inner], ffp["b1"][ff_inner:]
    h = ln_geglu(x2, params["ln3_g"], params["ln3_b"],
                 w_val, b_val, w_gate, b_gate, compute_dtype=cdt)
    x2 = matmul_bias_residual(h, ffp["w2"].astype(cdt), ffp["b2"], x2)

    return x2.reshape(B, N, C)


# ----------------------------- parameter init --------------------------------

def init_params(key, dim, n_heads, d_head, context_dim, ff_mult=4):
    inner = n_heads * d_head
    ff_inner = dim * ff_mult
    keys = iter(jax.random.split(key, 16))

    def w(k, din, dout):
        return jax.random.normal(k, (din, dout), jnp.float32) * 0.02

    def attn_params(k_dim):
        return {
            "wq": w(next(keys), dim, inner),
            "wk": w(next(keys), k_dim, inner),
            "wv": w(next(keys), k_dim, inner),
            "wo": w(next(keys), inner, dim),
            "bo": jnp.zeros((dim,), jnp.float32),
        }

    return {
        "attn1": attn_params(dim),
        "attn2": attn_params(context_dim),
        "ff": {
            "w1": w(next(keys), dim, 2 * ff_inner),
            "b1": jnp.zeros((2 * ff_inner,), jnp.float32),
            "w2": w(next(keys), ff_inner, dim),
            "b2": jnp.zeros((dim,), jnp.float32),
        },
        "ln1_g": jnp.ones((dim,), jnp.float32),
        "ln1_b": jnp.zeros((dim,), jnp.float32),
        "ln2_g": jnp.ones((dim,), jnp.float32),
        "ln2_b": jnp.zeros((dim,), jnp.float32),
        "ln3_g": jnp.ones((dim,), jnp.float32),
        "ln3_b": jnp.zeros((dim,), jnp.float32),
    }


# ----------------------------- pure-JAX reference ----------------------------

def reference_block(x, context, params, heads):
    def ln(t, g, b):
        mu = t.mean(-1, keepdims=True)
        var = ((t - mu) ** 2).mean(-1, keepdims=True)
        return (t - mu) / jnp.sqrt(var + 1e-5) * g + b

    def attn(xq, ctx, p):
        q = xq @ p["wq"]
        k = ctx @ p["wk"]
        v = ctx @ p["wv"]
        B, N, inner = q.shape
        d = inner // heads
        qh = q.reshape(B, N, heads, d).transpose(0, 2, 1, 3)
        kh = k.reshape(B, -1, heads, d).transpose(0, 2, 1, 3)
        vh = v.reshape(B, -1, heads, d).transpose(0, 2, 1, 3)
        s = jnp.einsum("bhid,bhjd->bhij", qh, kh) * (d ** -0.5)
        p_ = jax.nn.softmax(s, axis=-1)
        o = jnp.einsum("bhij,bhjd->bhid", p_, vh)
        o = o.transpose(0, 2, 1, 3).reshape(B, N, inner)
        return o @ p["wo"] + p["bo"]

    h = ln(x, params["ln1_g"], params["ln1_b"])
    x = attn(h, h, params["attn1"]) + x
    h = ln(x, params["ln2_g"], params["ln2_b"])
    ctx = h if context is None else context
    x = attn(h, ctx, params["attn2"]) + x
    h = ln(x, params["ln3_g"], params["ln3_b"])
    ffp = params["ff"]
    proj = h @ ffp["w1"] + ffp["b1"]
    ff_inner = ffp["w2"].shape[0]
    val, gate = proj[..., :ff_inner], proj[..., ff_inner:]
    return (val * jax.nn.gelu(gate, approximate=False)) @ ffp["w2"] + ffp["b2"] + x


# ----------------------------- main ------------------------------------------

if __name__ == "__main__":
    # Small but non-trivial shapes: exercises both matmul paths (single-K and
    # K-tiled via ff_inner=384 > _TK tile of 128) and the flash KV axis.
    dim, n_heads, d_head = 96, 4, 16
    context_dim = 48
    B, N, M = 2, 32, 16

    key = jax.random.PRNGKey(0)
    kx, kc, kp = jax.random.split(key, 3)
    x = jax.random.normal(kx, (B, N, dim), jnp.float32)
    context = jax.random.normal(kc, (B, M, context_dim), jnp.float32)
    params = init_params(kp, dim, n_heads, d_head, context_dim)

    # TODO(synk): the CUDA memory-stats based query slicing in CrossAttention is a
    # GPU memory heuristic only (math-equivalent to steps=1); on TPU the flash-style
    # KV grid axis bounds VMEM instead, so it is not reproduced.
    out = basic_transformer_block(x, context, params, n_heads)
    jax.block_until_ready(out)
    assert out.shape == (B, N, dim) and out.dtype == jnp.float32

    ref = reference_block(x, context, params, n_heads)
    err = float(jnp.max(jnp.abs(out - ref)))
    # bf16 matmul datapath vs f32 reference -> 2e-2 tolerance
    assert jnp.allclose(out, ref, rtol=2e-2, atol=2e-2), err

    print("KERNEL_OK")
</pallas_src>

<mosaic_0001>
module attributes {stable_mosaic.version = 11 : i64} {
  func.func @_proj_kernel(%arg0: i32, %arg1: i32, %arg2: memref<64x96xf32, #tpu.memory_space<vmem>>, %arg3: memref<1x96xf32, #tpu.memory_space<vmem>>, %arg4: memref<1x96xf32, #tpu.memory_space<vmem>>, %arg5: memref<96x64xbf16, #tpu.memory_space<vmem>>, %arg6: memref<96x64xbf16, #tpu.memory_space<vmem>>, %arg7: memref<96x64xbf16, #tpu.memory_space<vmem>>, %arg8: memref<64x64xbf16, #tpu.memory_space<vmem>>, %arg9: memref<64x64xbf16, #tpu.memory_space<vmem>>, %arg10: memref<64x64xbf16, #tpu.memory_space<vmem>>, %arg11: memref<64x96xbf16, #tpu.memory_space<vmem>>) attributes {dimension_semantics = [#tpu.dimension_semantics<parallel>, #tpu.dimension_semantics<arbitrary>], iteration_bounds = array<i64: 1, 1>, scalar_prefetch = 0 : i64, scratch_operands = 1 : i64, tpu.core_type = #tpu.core_type<tc>, window_params = [{transform_indices = @transform_0, window_bounds = array<i64: 64, 96>}, {pipeline_mode = #tpu.pipeline_mode<synchronous>, transform_indices = @transform_1, window_bounds = array<i64: 1, 96>}, {pipeline_mode = #tpu.pipeline_mode<synchronous>, transform_indices = @transform_2, window_bounds = array<i64: 1, 96>}, {transform_indices = @transform_3, window_bounds = array<i64: 96, 64>}, {transform_indices = @transform_4, window_bounds = array<i64: 96, 64>}, {transform_indices = @transform_5, window_bounds = array<i64: 96, 64>}, {transform_indices = @transform_6, window_bounds = array<i64: 64, 64>}, {transform_indices = @transform_7, window_bounds = array<i64: 64, 64>}, {transform_indices = @transform_8, window_bounds = array<i64: 64, 64>}]} {
    %c0_i32 = arith.constant 0 : i32
    %0 = arith.cmpi eq, %arg1, %c0_i32 : i32
    %1 = arith.extui %0 : i1 to i32
    %c0_i32_0 = arith.constant 0 : i32
    %2 = arith.cmpi ne, %1, %c0_i32_0 : i32
    scf.if %2 {
      %c0_17 = arith.constant 0 : index
      %c0_18 = arith.constant 0 : index
      %18 = vector.load %arg2[%c0_17, %c0_18] : memref<64x96xf32, #tpu.memory_space<vmem>>, vector<64x96xf32>
      %c0_19 = arith.constant 0 : index
      %c0_20 = arith.constant 0 : index
      %19 = vector.load %arg3[%c0_19, %c0_20] : memref<1x96xf32, #tpu.memory_space<vmem>>, vector<1x96xf32>
      %c0_21 = arith.constant 0 : index
      %c0_22 = arith.constant 0 : index
      %20 = vector.load %arg4[%c0_21, %c0_22] : memref<1x96xf32, #tpu.memory_space<vmem>>, vector<1x96xf32>
      %cst_23 = arith.constant dense<0.000000e+00> : vector<64xf32>
      %21 = vector.multi_reduction <add>, %18, %cst_23 [1] : vector<64x96xf32> to vector<64xf32>
      %22 = vector.shape_cast %21 : vector<64xf32> to vector<64x1xf32>
      %cst_24 = arith.constant 9.600000e+01 : f32
      %23 = vector.broadcast %cst_24 : f32 to vector<64x1xf32>
      %24 = arith.divf %22, %23 : vector<64x1xf32>
      %25 = vector.broadcast %24 : vector<64x1xf32> to vector<64x96xf32>
      %26 = arith.subf %18, %25 : vector<64x96xf32>
      %27 = arith.mulf %26, %26 : vector<64x96xf32>
      %cst_25 = arith.constant dense<0.000000e+00> : vector<64xf32>
      %28 = vector.multi_reduction <add>, %27, %cst_25 [1] : vector<64x96xf32> to vector<64xf32>
      %29 = vector.shape_cast %28 : vector<64xf32> to vector<64x1xf32>
      %cst_26 = arith.constant 9.600000e+01 : f32
      %30 = vector.broadcast %cst_26 : f32 to vector<64x1xf32>
      %31 = arith.divf %29, %30 : vector<64x1xf32>
      %32 = vector.broadcast %24 : vector<64x1xf32> to vector<64x96xf32>
      %33 = arith.subf %18, %32 : vector<64x96xf32>
      %cst_27 = arith.constant 9.99999974E-6 : f32
      %34 = vector.broadcast %cst_27 : f32 to vector<64x1xf32>
      %35 = arith.addf %31, %34 : vector<64x1xf32>
      %36 = math.rsqrt %35 : vector<64x1xf32>
      %37 = vector.broadcast %36 : vector<64x1xf32> to vector<64x96xf32>
      %38 = arith.mulf %33, %37 : vector<64x96xf32>
      %39 = vector.broadcast %19 : vector<1x96xf32> to vector<64x96xf32>
      %40 = arith.mulf %38, %39 : vector<64x96xf32>
      %41 = vector.broadcast %20 : vector<1x96xf32> to vector<64x96xf32>
      %42 = arith.addf %40, %41 : vector<64x96xf32>
      %43 = arith.truncf %42 : vector<64x96xf32> to vector<64x96xbf16>
      %c0_28 = arith.constant 0 : index
      %c0_29 = arith.constant 0 : index
      %44 = vector.load %arg11[%c0_28, %c0_29] : memref<64x96xbf16, #tpu.memory_space<vmem>>, vector<64x96xbf16>
      tpu.vector_store %arg11[%c0_28, %c0_29], %43 {strides = array<i32>} : memref<64x96xbf16, #tpu.memory_space<vmem>>, vector<64x96xbf16>,
    } else {
    }
    %c0 = arith.constant 0 : index
    %c0_1 = arith.constant 0 : index
    %3 = vector.load %arg11[%c0, %c0_1] : memref<64x96xbf16, #tpu.memory_space<vmem>>, vector<64x96xbf16>
    %c0_2 = arith.constant 0 : index
    %c0_3 = arith.constant 0 : index
    %4 = vector.load %arg5[%c0_2, %c0_3] : memref<96x64xbf16, #tpu.memory_space<vmem>>, vector<96x64xbf16>
    %cst = arith.constant dense<0.000000e+00> : vector<64x64xf32>
    %5 = tpu.matmul %3, %4, %cst {dimension_numbers = #tpu.dot_dimension_numbers<[1], [0], [0], [1], [0, 0, 1, 1], [], []>} : vector<64x96xbf16>, vector<96x64xbf16>, vector<64x64xf32> -> vector<64x64xf32>
    %cst_4 = arith.constant 2.500000e-01 : f32
    %6 = vector.broadcast %cst_4 : f32 to vector<64x64xf32>
    %7 = arith.mulf %5, %6 : vector<64x64xf32>
    %8 = arith.truncf %7 : vector<64x64xf32> to vector<64x64xbf16>
    %c0_5 = arith.constant 0 : index
    %c0_6 = arith.constant 0 : index
    %9 = vector.load %arg8[%c0_5, %c0_6] : memref<64x64xbf16, #tpu.memory_space<vmem>>, vector<64x64xbf16>
    tpu.vector_store %arg8[%c0_5, %c0_6], %8 {strides = array<i32>} : memref<64x64xbf16, #tpu.memory_space<vmem>>, vector<64x64xbf16>,
    %c0_7 = arith.constant 0 : index
    %c0_8 = arith.constant 0 : index
    %10 = vector.load %arg6[%c0_7, %c0_8] : memref<96x64xbf16, #tpu.memory_space<vmem>>, vector<96x64xbf16>
    %cst_9 = arith.constant dense<0.000000e+00> : vector<64x64xf32>
    %11 = tpu.matmul %3, %10, %cst_9 {dimension_numbers = #tpu.dot_dimension_numbers<[1], [0], [0], [1], [0, 0, 1, 1], [], []>} : vector<64x96xbf16>, vector<96x64xbf16>, vector<64x64xf32> -> vector<64x64xf32>
    %12 = arith.truncf %11 : vector<64x64xf32> to vector<64x64xbf16>
    %c0_10 = arith.constant 0 : index
    %c0_11 = arith.constant 0 : index
    %13 = vector.load %arg9[%c0_10, %c0_11] : memref<64x64xbf16, #tpu.memory_space<vmem>>, vector<64x64xbf16>
    tpu.vector_store %arg9[%c0_10, %c0_11], %12 {strides = array<i32>} : memref<64x64xbf16, #tpu.memory_space<vmem>>, vector<64x64xbf16>,
    %c0_12 = arith.constant 0 : index
    %c0_13 = arith.constant 0 : index
    %14 = vector.load %arg7[%c0_12, %c0_13] : memref<96x64xbf16, #tpu.memory_space<vmem>>, vector<96x64xbf16>
    %cst_14 = arith.constant dense<0.000000e+00> : vector<64x64xf32>
    %15 = tpu.matmul %3, %14, %cst_14 {dimension_numbers = #tpu.dot_dimension_numbers<[1], [0], [0], [1], [0, 0, 1, 1], [], []>} : vector<64x96xbf16>, vector<96x64xbf16>, vector<64x64xf32> -> vector<64x64xf32>
    %16 = arith.truncf %15 : vector<64x64xf32> to vector<64x64xbf16>
    %c0_15 = arith.constant 0 : index
    %c0_16 = arith.constant 0 : index
    %17 = vector.load %arg10[%c0_15, %c0_16] : memref<64x64xbf16, #tpu.memory_space<vmem>>, vector<64x64xbf16>
    tpu.vector_store %arg10[%c0_15, %c0_16], %16 {strides = array<i32>} : memref<64x64xbf16, #tpu.memory_space<vmem>>, vector<64x64xbf16>,
    return
  }
  func.func @transform_0(%arg0: i32, %arg1: i32) -> (i32, i32) {
    %c0_i32 = arith.constant 0 : i32
    %c0_i32_0 = arith.constant 0 : i32
    return %arg0, %c0_i32 : i32, i32
  }
  func.func @transform_1(%arg0: i32, %arg1: i32) -> (i32, i32) {
    %c0_i32 = arith.constant 0 : i32
    %c0_i32_0 = arith.constant 0 : i32
    %c0_i32_1 = arith.constant 0 : i32
    return %c0_i32, %c0_i32_0 : i32, i32
  }
  func.func @transform_2(%arg0: i32, %arg1: i32) -> (i32, i32) {
    %c0_i32 = arith.constant 0 : i32
    %c0_i32_0 = arith.constant 0 : i32
    %c0_i32_1 = arith.constant 0 : i32
    return %c0_i32, %c0_i32_0 : i32, i32
  }
  func.func @transform_3(%arg0: i32, %arg1: i32) -> (i32, i32) {
    %c0_i32 = arith.constant 0 : i32
    %c0_i32_0 = arith.constant 0 : i32
    return %c0_i32, %arg1 : i32, i32
  }
  func.func @transform_4(%arg0: i32, %arg1: i32) -> (i32, i32) {
    %c0_i32 = arith.constant 0 : i32
    %c0_i32_0 = arith.constant 0 : i32
    return %c0_i32, %arg1 : i32, i32
  }
  func.func @transform_5(%arg0: i32, %arg1: i32) -> (i32, i32) {
    %c0_i32 = arith.constant 0 : i32
    %c0_i32_0 = arith.constant 0 : i32
    return %c0_i32, %arg1 : i32, i32
  }
  func.func @transform_6(%arg0: i32, %arg1: i32) -> (i32, i32) {
    %c0_i32 = arith.constant 0 : i32
    return %arg0, %arg1 : i32, i32
  }
  func.func @transform_7(%arg0: i32, %arg1: i32) -> (i32, i32) {
    %c0_i32 = arith.constant 0 : i32
    return %arg0, %arg1 : i32, i32
  }
  func.func @transform_8(%arg0: i32, %arg1: i32) -> (i32, i32) {
    %c0_i32 = arith.constant 0 : i32
    return %arg0, %arg1 : i32, i32
  }
}

</mosaic_0001>

<bundles_post_ra>
// kernel: tpu_custom_call.1
= control target key start
LH: loop header
LB: loop body
LE: loop exit
PB: predicated region body
PF: predicated region fallthrough
CT: control target
= control target key end

     0   :  { %14 = vsyncpa [#allocation4], 0  ;;  %vm43_vm0 = vcmask 785408   ;;  %s1296_s0 = inlined_call_operand.vmem [shape: f32[64,96], index: 0, kind: input, shape index: {}]   ;;  %s1297_s1 = inlined_call_operand.vmem [shape: f32[1,96], index: 1, kind: input, shape index: {}]   ;;  %s1298_s2 = inlined_call_operand.vmem [shape: f32[1,96], index: 2, kind: input, shape index: {}]   ;;  %s1299_s3 = inlined_call_operand.vmem [shape: bf16[96,64], index: 3, kind: input, shape index: {}]   ;;  %s1300_s4 = inlined_call_operand.vmem [shape: bf16[96,64], index: 4, kind: input, shape index: {}]   ;;  %s1301_s5 = inlined_call_operand.vmem [shape: bf16[96,64], index: 5, kind: input, shape index: {}]   ;;  %s1302_s6 = inlined_call_operand.hbm [shape: bf16[64,64], index: 6, kind: output, shape index: {0}]   ;;  %s1303_s7 = inlined_call_operand.hbm [shape: bf16[64,64], index: 7, kind: output, shape index: {1}]   ;;  %s1304_s8 = inlined_call_operand.hbm [shape: bf16[64,64], index: 8, kind: output, shape index: {2}]  }
   0x1   :  { %v33_v0 = vld [vmem:[%s1296_s0] sm:$0xff]  ;;  %v35_v1 = vld [vmem:[%s1296_s0 + $0x10] sm:$0xff]  ;;  %v34_v2 = vld [vmem:[%s1296_s0 + $0x8] sm:$0xff] }
   0x2   :  { %v44_v3 = vsel %vm43_vm0, %v33_v0, 0.0  ;;  %v50_v4 = vsel %vm43_vm0, %v35_v1, 0.0  ;;  %v36_v5 = vld [vmem:[%s1296_s0 + $0x18] sm:$0xff]  ;;  %v37_v6 = vld [vmem:[%s1296_s0 + $0x20] sm:$0xff]  ;;  %v38_v7 = vld [vmem:[%s1296_s0 + $0x28] sm:$0xff]  ;;  %v47_v8 = vsel %vm43_vm0, %v34_v2, 0.0 }
   0x3   :  { %45 = vadd.xlane.f32.xlu0 %v44_v3  ;;  %51 = vadd.xlane.f32.xlu1 %v50_v4  ;;  %v53_v9 = vsel %vm43_vm0, %v36_v5, 0.0  ;;  %v56_v10 = vsel %vm43_vm0, %v37_v6, 0.0  ;;  %v59_v11 = vsel %vm43_vm0, %v38_v7, 0.0  ;;  %v39_v12 = vld [vmem:[%s1296_s0 + $0x30] sm:$0xff]  ;;  %v40_v13 = vld [vmem:[%s1296_s0 + $0x38] sm:$0xff] }
   0x4   :  { %v62_v14 = vsel %vm43_vm0, %v39_v12, 0.0  ;;  %v65_v15 = vsel %vm43_vm0, %v40_v13, 0.0 }
   0x7   :  { %48 = vadd.xlane.f32.xlu0 %v47_v8  ;;  %54 = vadd.xlane.f32.xlu1 %v53_v9 }
   0xb   :  { %57 = vadd.xlane.f32.xlu0 %v56_v10  ;;  %60 = vadd.xlane.f32.xlu1 %v59_v11 }
   0xf   :  { %63 = vadd.xlane.f32.xlu0 %v62_v14  ;;  %66 = vadd.xlane.f32.xlu1 %v65_v15 }
  0x10   :  { %15 = vsyncpa [#allocation6], 0  ;;  %v904_v56 = vld [vmem:[%s1299_s3] sm:$0xff]   ;;  %v906_v58 = vld [vmem:[%s1299_s3 + $0x8] sm:$0xff]   ;;  %vm355_vm1 = vcmask 519168   ;;  %s1009_s12 = smov [#allocation3]  }
  0x11   :  { %v905_v57 = vld [vmem:[%s1300_s4] sm:$0xff]   ;;  %827 = vmatprep.subr.bf16.mxu0 %v904_v56  ;;  %v907_v59 = vld [vmem:[%s1300_s4 + $0x8] sm:$0xff]   ;;  %v908_v60 = vld [vmem:[%s1299_s3 + $0x10] sm:$0xff]   ;;  %s675_s13 = sshll.u32 %s1009_s12, 4  ;;  %s1234_s13 = int_to_ptr.vmem [resolvable:$true] %s675_s13 }
  0x12   :  { %847 = vmatprep.subr.bf16.mxu1 %v905_v57  ;;  %828 = vmatpush3.bf16.msra.mxu0 %v904_v56  ;;  %v909_v61 = vld [vmem:[%s1300_s4 + $0x10] sm:$0xff]   ;;  %v910_v62 = vld [vmem:[%s1299_s3 + $0x18] sm:$0xff]   ;;  %v915_v3 = vld [vmem:[%s1300_s4 + $0x28] sm:$0xff]  }
  0x13   :  { %848 = vmatpush3.bf16.msra.mxu1 %v905_v57  ;;  %829 = vmatprep.subr.bf16.mxu0 %v906_v58  ;;  %v911_v63 = vld [vmem:[%s1300_s4 + $0x18] sm:$0xff]   ;;  %v1169_v4 = vld [vmem:[%s1301_s5] sm:$0xff]  }
  0x14   :  { %849 = vmatprep.subr.bf16.mxu1 %v907_v59 }
  0x16   :  { %830 = vmatpush3.bf16.msra.mxu0 %v906_v58 }
  0x17   :  { %850 = vmatpush3.bf16.msra.mxu1 %v907_v59  ;;  %831 = vmatprep.subr.bf16.mxu0 %v908_v60 }
  0x18   :  { %851 = vmatprep.subr.bf16.mxu1 %v909_v61 }
  0x1a   :  { %832 = vmatpush3.bf16.msra.mxu0 %v908_v60 }
  0x1b   :  { %852 = vmatpush3.bf16.msra.mxu1 %v909_v61  ;;  %833 = vmatprep.subr.bf16.mxu0 %v910_v62 }
  0x1c   :  { %853 = vmatprep.subr.bf16.mxu1 %v911_v63 }
  0x1e   :  { %834 = vmatpush3.bf16.msra.mxu0 %v910_v62 }
  0x1f   :  { %854 = vmatpush3.bf16.msra.mxu1 %v911_v63 }
  0x90   :  { %v46_v16 = vpop.xlane.xlu0 %45  ;;  %v52_v17 = vpop.xlane.xlu1 %51 }
  0x91   :  { %v69_v18 = vmul.f32 0.010416667, %v46_v16  ;;  %v71_v19 = vmul.f32 0.010416667, %v52_v17 }
  0x93   :  { %v1090_v20 = vsub.f32 %v33_v0, %v69_v18  ;;  %v1092_v21 = vsub.f32 %v35_v1, %v71_v19  ;;  %v912_v0 = vld [vmem:[%s1299_s3 + $0x20] sm:$0xff]  }
  0x94   :  { %v49_v22 = vpop.xlane.xlu0 %48  ;;  %v55_v23 = vpop.xlane.xlu1 %54  ;;  %v913_v1 = vld [vmem:[%s1300_s4 + $0x20] sm:$0xff]   ;;  %835 = vmatprep.subr.bf16.mxu0 %v912_v0 }
  0x95   :  { %v70_v24 = vmul.f32 0.010416667, %v49_v22  ;;  %v72_v25 = vmul.f32 0.010416667, %v55_v23  ;;  %v85_v26 = vmul.f32 %v1090_v20, %v1090_v20  ;;  %v87_v27 = vmul.f32 %v1092_v21, %v1092_v21  ;;  %855 = vmatprep.subr.bf16.mxu1 %v913_v1  ;;  %836 = vmatpush3.bf16.msra.mxu0 %v912_v0 }
  0x96   :  { %856 = vmatpush3.bf16.msra.mxu1 %v913_v1 }
  0x97   :  { %v1098_v28 = vsub.f32 %v34_v2, %v70_v24  ;;  %v1100_v29 = vsub.f32 %v36_v5, %v72_v25  ;;  %v93_v30 = vsel %vm43_vm0, %v85_v26, 0.0  ;;  %v99_v33 = vsel %vm43_vm0, %v87_v27, 0.0  ;;  %v914_v2 = vld [vmem:[%s1299_s3 + $0x28] sm:$0xff]   ;;  %857 = vmatprep.subr.bf16.mxu1 %v915_v3 }
  0x98   :  { %94 = vadd.xlane.f32.xlu0 %v93_v30  ;;  %v58_v31 = vpop.xlane.xlu0 %57  ;;  %v61_v32 = vpop.xlane.xlu1 %60  ;;  %837 = vmatprep.subr.bf16.mxu0 %v914_v2 }
  0x99   :  { %v73_v34 = vmul.f32 0.010416667, %v58_v31  ;;  %v74_v35 = vmul.f32 0.010416667, %v61_v32  ;;  %v86_v36 = vmul.f32 %v1098_v28, %v1098_v28  ;;  %v88_v37 = vmul.f32 %v1100_v29, %v1100_v29  ;;  %838 = vmatpush3.bf16.msra.mxu0 %v914_v2 }
  0x9a   :  { %858 = vmatpush3.bf16.msra.mxu1 %v915_v3  ;;  %867 = vmatprep.subr.bf16.mxu0 %v1169_v4 }
  0x9b   :  { %v1108_v38 = vsub.f32 %v37_v6, %v73_v34  ;;  %v1110_v39 = vsub.f32 %v38_v7, %v74_v35  ;;  %v96_v40 = vsel %vm43_vm0, %v86_v36, 0.0  ;;  %v102_v43 = vsel %vm43_vm0, %v88_v37, 0.0  ;;  %887 = vmatprep.subr.bf16.mxu1 %v1169_v4 }
  0x9c   :  { %100 = vadd.xlane.f32.xlu0 %v99_v33  ;;  %97 = vadd.xlane.f32.xlu1 %v96_v40  ;;  %v64_v41 = vpop.xlane.xlu0 %63  ;;  %v67_v42 = vpop.xlane.xlu1 %66  ;;  %v717_v33 = vld [vmem:[%s1297_s1] ss:$0 sm:$0xff] }
  0x9d   :  { %v75_v44 = vmul.f32 0.010416667, %v64_v41  ;;  %v76_v45 = vmul.f32 0.010416667, %v67_v42  ;;  %v89_v46 = vmul.f32 %v1108_v38, %v1108_v38  ;;  %v90_v47 = vmul.f32 %v1110_v39, %v1110_v39  ;;  %v718_v42 = vld [vmem:[%s1298_s2] ss:$0 sm:$0xff] }
  0x9f   :  { %v1118_v48 = vsub.f32 %v39_v12, %v75_v44  ;;  %v1120_v49 = vsub.f32 %v40_v13, %v76_v45  ;;  %v105_v50 = vsel %vm43_vm0, %v89_v46, 0.0  ;;  %v108_v51 = vsel %vm43_vm0, %v90_v47, 0.0 }
  0xa0   :  { %103 = vadd.xlane.f32.xlu1 %v102_v43  ;;  %106 = vadd.xlane.f32.xlu0 %v105_v50 }
  0xa1   :  { %v91_v52 = vmul.f32 %v1118_v48, %v1118_v48  ;;  %v92_v53 = vmul.f32 %v1120_v49, %v1120_v49 }
  0xa3   :  { %v111_v54 = vsel %vm43_vm0, %v91_v52, 0.0  ;;  %v114_v55 = vsel %vm43_vm0, %v92_v53, 0.0 }
  0xa4   :  { %109 = vadd.xlane.f32.xlu1 %v108_v51  ;;  %112 = vadd.xlane.f32.xlu0 %v111_v54 }
  0xa8   :  { %115 = vadd.xlane.f32.xlu1 %v114_v55 }
 0x125   :  { %v95_v5 = vpop.xlane.xlu0 %94 }
 0x126   :  { %v117_v6 = vmul.f32 0.010416667, %v95_v5 }
 0x128   :  { %v125_v7 = vadd.f32 1e-05, %v117_v6 }
 0x129   :  { %v98_v8 = vpop.xlane.xlu1 %97  ;;  %v101_v9 = vpop.xlane.xlu0 %100 }
 0x12a   :  { %922 = vrsqrt.f32 %v125_v7  ;;  %v118_v10 = vmul.f32 0.010416667, %v98_v8  ;;  %v119_v11 = vmul.f32 0.010416667, %v101_v9 }
 0x12c   :  { %v126_v12 = vadd.f32 1e-05, %v118_v10  ;;  %v127_v13 = vadd.f32 1e-05, %v119_v11  ;;  %v920_v10 = vld [vmem:[%s1301_s5 + $0x20] sm:$0xff]   ;;  %v921_v11 = vld [vmem:[%s1301_s5 + $0x28] sm:$0xff]  }
 0x12d   :  { %v104_v14 = vpop.xlane.xlu1 %103  ;;  %v107_v15 = vpop.xlane.xlu0 %106 }
 0x12e   :  { %924 = vrsqrt.f32 %v126_v12  ;;  %v120_v16 = vmul.f32 0.010416667, %v104_v14  ;;  %v121_v17 = vmul.f32 0.010416667, %v107_v15 }
 0x12f   :  { %926 = vrsqrt.f32 %v127_v13 }
 0x130   :  { %v128_v18 = vadd.f32 1e-05, %v120_v16  ;;  %v129_v19 = vadd.f32 1e-05, %v121_v17 }
 0x131   :  { %v110_v22 = vpop.xlane.xlu1 %109  ;;  %v113_v23 = vpop.xlane.xlu0 %112 }
 0x132   :  { %928 = vrsqrt.f32 %v128_v18  ;;  %v122_v24 = vmul.f32 0.010416667, %v110_v22  ;;  %v123_v25 = vmul.f32 0.010416667, %v113_v23 }
 0x133   :  { %930 = vrsqrt.f32 %v129_v19 }
 0x134   :  { %v923_v26 = vpop.eup %922  ;;  %v130_v27 = vadd.f32 1e-05, %v122_v24  ;;  %v131_v30 = vadd.f32 1e-05, %v123_v25 }
 0x135   :  { %v141_v31 = vmul.f32 %v923_v26, %v1090_v20  ;;  %v116_v32 = vpop.xlane.xlu1 %115 }
 0x136   :  { %932 = vrsqrt.f32 %v130_v27  ;;  %v124_v34 = vmul.f32 0.010416667, %v116_v32 }
 0x137   :  { %934 = vrsqrt.f32 %v131_v30  ;;  %v155_v40 = vmul.f32 %v717_v33, %v141_v31 }
 0x138   :  { %v925_v35 = vpop.eup %924  ;;  %v132_v36 = vadd.f32 1e-05, %v124_v34 }
 0x139   :  { %v927_v37 = vpop.eup %926  ;;  %v142_v41 = vmul.f32 %v925_v35, %v1098_v28  ;;  %v169_v46 = vadd.f32 %v718_v42, %v155_v40 }
 0x13a   :  { %v143_v20 = vmul.f32 %v927_v37, %v1092_v21  ;;  %936 = vrsqrt.f32 %v132_v36 }
 0x13b   :  { %v156_v43 = vmul.f32 %v717_v33, %v142_v41 }
 0x13c   :  { %v929_v44 = vpop.eup %928  ;;  %v157_v50 = vmul.f32 %v717_v33, %v143_v20 }
 0x13d   :  { %v931_v45 = vpop.eup %930  ;;  %v170_v47 = vadd.f32 %v718_v42, %v156_v43  ;;  %v144_v51 = vmul.f32 %v929_v44, %v1100_v29 }
 0x13e   :  { %v145_v52 = vmul.f32 %v931_v45, %v1108_v38  ;;  %v171_v56 = vadd.f32 %v718_v42, %v157_v50 }
 0x13f   :  { %v177_v53 = vpack.c.bf16 %v170_v47, %v169_v46  ;;  %v158_v54 = vmul.f32 %v717_v33, %v144_v51 }
 0x140   :  { %v933_v28 = vpop.eup %932  ;;  %v159_v21 = vmul.f32 %v717_v33, %v145_v52 }
 0x141   :  { %v935_v55 = vpop.eup %934  ;;  %181 = vst.msk [vmem:[#allocation2] sm:$0xff] %vm43_vm0, %v177_v53  ;;  %v172_v57 = vadd.f32 %v718_v42, %v158_v54  ;;  %v146_v58 = vmul.f32 %v933_v28, %v1110_v39 }
 0x142   :  { %v147_v59 = vmul.f32 %v935_v55, %v1118_v48  ;;  %v173_v29 = vadd.f32 %v718_v42, %v159_v21  ;;  %v917_v48 = vld [vmem:[%s1301_s5 + $0x8] sm:$0xff]  }
 0x143   :  { %v178_v60 = vpack.c.bf16 %v172_v57, %v171_v56  ;;  %v160_v61 = vmul.f32 %v717_v33, %v146_v58 }
 0x144   :  { %v937_v62 = vpop.eup %936  ;;  %v161_v63 = vmul.f32 %v717_v33, %v147_v59 }
 0x145   :  { %182 = vst.msk [vmem:[#allocation2 + $0x8] sm:$0xff] %vm43_vm0, %v178_v60  ;;  %v174_v38 = vadd.f32 %v718_v42, %v160_v61  ;;  %v148_v0 = vmul.f32 %v937_v62, %v1120_v49  ;;  %v918_v49 = vld [vmem:[%s1301_s5 + $0x10] sm:$0xff]  }
 0x146   :  { %v175_v5 = vadd.f32 %v718_v42, %v161_v63 }
 0x147   :  { %v179_v1 = vpack.c.bf16 %v174_v38, %v173_v29  ;;  %v162_v2 = vmul.f32 %v717_v33, %v148_v0 }
 0x148   :  { %v185_v3 = vld [vmem:[#allocation2] sm:$0xff] }
 0x149   :  { %183 = vst.msk [vmem:[#allocation2 + $0x10] sm:$0xff] %vm43_vm0, %v179_v1  ;;  %v176_v6 = vadd.f32 %v718_v42, %v162_v2  ;;  %839 = vmatprep.mubr.msk.bf16.mxu0 %vm43_vm0, %v185_v3  ;;  %859 = vmatprep.mubr.msk.bf16.mxu1 %vm43_vm0, %v185_v3 }
 0x14b   :  { %v180_v39 = vpack.c.bf16 %v176_v6, %v175_v5 }
 0x14c   :  { %v186_v7 = vld [vmem:[#allocation2 + $0x8] sm:$0xff] }
 0x14d   :  { %184 = vst.msk [vmem:[#allocation2 + $0x18] sm:$0xff] %vm43_vm0, %v180_v39  ;;  %840 = vmatmul.mubr.msk.bf16.vlgmr.msra.gmra.mrb[0].mxu0 %vm43_vm0, %v186_v7  ;;  %860 = vmatmul.mubr.msk.bf16.vlgmr.msra.gmra.mrb[0].mxu1 %vm43_vm0, %v186_v7 }
 0x14e   :  { %868 = vmatpush3.bf16.msra.mxu0 %v1169_v4  ;;  %893 = vmatpush3.bf16.msra.mxu1 %v1169_v4  ;;  %v919_v4 = vld [vmem:[%s1301_s5 + $0x18] sm:$0xff]   ;;  %s1008_s5 = smov [#allocation5]  }
 0x14f   :  { %869 = vmatprep.subr.bf16.mxu0 %v917_v48  ;;  %888 = vmatprep.subr.bf16.mxu1 %v917_v48  ;;  %s687_s11 = sshll.u32 %s1008_s5, 4  ;;  %s688_s11 = int_to_ptr.vmem [resolvable:$true] %s687_s11 }
 0x150   :  { %v187_v8 = vld [vmem:[#allocation2 + $0x10] sm:$0xff]  ;;  %s938_s14 = scalar_lea.vmem %s688_s11, 512  ;;  %p943_p1 = scmp.lt.s32.totalorder %s688_s11, %s688_s11 }
 0x151   :  { %843 = vmatprep.mubr.msk.bf16.mxu0 %vm43_vm0, %v187_v8  ;;  %863 = vmatprep.mubr.msk.bf16.mxu1 %vm43_vm0, %v187_v8  ;;  %p939_p0 = scmp.ne.s32.totalorder %s688_s11, %s938_s14  ;;  %p944_p2 = scmp.lt.s32.totalorder %s938_s14, %s938_s14 }
 0x152   :  { %870 = vmatpush3.bf16.msra.mxu0 %v917_v48  ;;  %894 = vmatpush3.bf16.msra.mxu1 %v917_v48 }
 0x153   :  { %871 = vmatprep.subr.bf16.mxu0 %v918_v49  ;;  %889 = vmatprep.subr.bf16.mxu1 %v918_v49  ;;  %p945_p3 = por %p944_p2, %p943_p1 }
 0x154   :  { %v188_v9 = vld [vmem:[#allocation2 + $0x18] sm:$0xff] }
 0x155   :  { %844 = vmatmul.mubr.msk.bf16.gmra.mrb[4].mxu0 %vm43_vm0, %v188_v9  ;;  %864 = vmatmul.mubr.msk.bf16.gmra.mrb[4].mxu1 %vm43_vm0, %v188_v9  ;;  %p946_p4 = pnand %p945_p3, %p939_p0 }
 0x156   :  { %872 = vmatpush3.bf16.msra.mxu0 %v918_v49  ;;  %895 = vmatpush3.bf16.msra.mxu1 %v918_v49 }
 0x157   :  { %879 = vmatprep.mubr.msk.bf16.mxu0 %vm43_vm0, %v185_v3  ;;  %883 = vmatprep.mubr.msk.bf16.mxu1 %vm43_vm0, %v187_v8 }
 0x158   :  { %873 = vmatprep.subr.bf16.mxu0 %v919_v4  ;;  %890 = vmatprep.subr.bf16.mxu1 %v919_v4 }
 0x15a   :  { %874 = vmatpush3.bf16.msra.mxu0 %v919_v4  ;;  %896 = vmatpush3.bf16.msra.mxu1 %v919_v4 }
 0x15b   :  { %875 = vmatprep.subr.bf16.mxu0 %v920_v10  ;;  %891 = vmatprep.subr.bf16.mxu1 %v920_v10 }
 0x15e   :  { %876 = vmatpush3.bf16.msra.mxu0 %v920_v10  ;;  %897 = vmatpush3.bf16.msra.mxu1 %v920_v10 }
 0x15f   :  { %877 = vmatprep.subr.bf16.mxu0 %v921_v11  ;;  %892 = vmatprep.subr.bf16.mxu1 %v921_v11 }
 0x162   :  { %878 = vmatpush3.bf16.msra.mxu0 %v921_v11  ;;  %898 = vmatpush3.bf16.msra.mxu1 %v921_v11 }
 0x165   :  { %880 = vmatmul.mubr.msk.bf16.vlgmr.msra.gmra.mrb[8].mxu0 %vm43_vm0, %v186_v7  ;;  %884 = vmatmul.mubr.msk.bf16.vlgmr.msra.gmra.mrb[8].mxu1 %vm43_vm0, %v188_v9 }
 0x220   :  { %v841_v12 = vpop.f32.mrb[0].mxu0  ;;  %v861_v13 = vpop.f32.mrb[0].mxu1 }
 0x221   :  { %v317_v14 = vmul.f32 0.25, %v841_v12  ;;  %v783_v15 = vpack.c.bf16 %v861_v13, %v861_v13  ;;  %v284_v16 = vpop.f32.mrb[1].mxu0  ;;  %v446_v17 = vpop.f32.mrb[1].mxu1 }
 0x222   :  { %v315_v18 = vmul.f32 0.25, %v284_v16  ;;  %v781_v19 = vpack.c.bf16 %v446_v17, %v446_v17  ;;  %v842_v22 = vpop.f32.mrb[2].mxu0  ;;  %v862_v23 = vpop.f32.mrb[2].mxu1 }
 0x223   :  { %v775_v24 = vpack.c.bf16 %v317_v14, %v317_v14  ;;  %511 = vst.msk [vmem:[#allocation5 + $0x8] sm:$0xf] %vm355_vm1, %v783_v15  ;;  %v318_v25 = vmul.f32 0.25, %v842_v22  ;;  %v784_v26 = vpack.c.bf16 %v862_v23, %v862_v23  ;;  %v287_v27 = vpop.f32.mrb[3].mxu0  ;;  %v449_v30 = vpop.f32.mrb[3].mxu1 }
 0x224   :  { %v773_v31 = vpack.c.bf16 %v315_v18, %v315_v18  ;;  %509 = vst.msk [vmem:[#allocation5] sm:$0xf] %vm355_vm1, %v781_v19  ;;  %v316_v32 = vmul.f32 0.25, %v287_v27  ;;  %v782_v33 = vpack.c.bf16 %v449_v30, %v449_v30 }
 0x225   :  { %358 = vst.msk [vmem:[#allocation3 + $0x8] sm:$0xf] %vm355_vm1, %v775_v24  ;;  %v776_v34 = vpack.c.bf16 %v318_v25, %v318_v25  ;;  %512 = vst.msk [vmem:[#allocation5 + $0xc] sm:$0xf] %vm355_vm1, %v784_v26 }
 0x226   :  { %356 = vst.msk [vmem:[#allocation3] sm:$0xf] %vm355_vm1, %v773_v31  ;;  %v774_v35 = vpack.c.bf16 %v316_v32, %v316_v32  ;;  %510 = vst.msk [vmem:[#allocation5 + $0x4] sm:$0xf] %vm355_vm1, %v782_v33 }
 0x227   :  { %359 = vst.msk [vmem:[#allocation3 + $0xc] sm:$0xf] %vm355_vm1, %v776_v34 }
 0x228   :  { %357 = vst.msk [vmem:[#allocation3 + $0x4] sm:$0xf] %vm355_vm1, %v774_v35  ;;  %v845_v36 = vpop.f32.mrb[4].mxu0  ;;  %v865_v37 = vpop.f32.mrb[4].mxu1 }
 0x229   :  { %v321_v40 = vmul.f32 0.25, %v845_v36  ;;  %v787_v41 = vpack.c.bf16 %v865_v37, %v865_v37  ;;  %v300_v42 = vpop.f32.mrb[5].mxu0  ;;  %v462_v20 = vpop.f32.mrb[5].mxu1 }
 0x22a   :  { %v319_v43 = vmul.f32 0.25, %v300_v42  ;;  %v785_v44 = vpack.c.bf16 %v462_v20, %v462_v20  ;;  %v846_v45 = vpop.f32.mrb[6].mxu0  ;;  %v866_v46 = vpop.f32.mrb[6].mxu1 }
 0x22b   :  { %v779_v47 = vpack.c.bf16 %v321_v40, %v321_v40  ;;  %515 = vst.msk [vmem:[#allocation5 + $0x18] sm:$0xf] %vm355_vm1, %v787_v41  ;;  %v322_v50 = vmul.f32 0.25, %v846_v45  ;;  %v788_v51 = vpack.c.bf16 %v866_v46, %v866_v46  ;;  %v303_v52 = vpop.f32.mrb[7].mxu0  ;;  %v465_v53 = vpop.f32.mrb[7].mxu1 }
 0x22c   :  { %v777_v54 = vpack.c.bf16 %v319_v43, %v319_v43  ;;  %513 = vst.msk [vmem:[#allocation5 + $0x10] sm:$0xf] %vm355_vm1, %v785_v44  ;;  %v320_v28 = vmul.f32 0.25, %v303_v52  ;;  %v786_v55 = vpack.c.bf16 %v465_v53, %v465_v53 }
 0x22d   :  { %362 = vst.msk [vmem:[#allocation3 + $0x18] sm:$0xf] %vm355_vm1, %v779_v47  ;;  %v780_v56 = vpack.c.bf16 %v322_v50, %v322_v50  ;;  %516 = vst.msk [vmem:[#allocation5 + $0x1c] sm:$0xf] %vm355_vm1, %v788_v51 }
 0x22e   :  { %360 = vst.msk [vmem:[#allocation3 + $0x10] sm:$0xf] %vm355_vm1, %v777_v54  ;;  %v778_v57 = vpack.c.bf16 %v320_v28, %v320_v28  ;;  %514 = vst.msk [vmem:[#allocation5 + $0x14] sm:$0xf] %vm355_vm1, %v786_v55 }
 0x22f   :  { %363 = vst.msk [vmem:[#allocation3 + $0x1c] sm:$0xf] %vm355_vm1, %v780_v56 }
 0x230   :  { %949 = shalt.err (!%p946_p4)
}
 0x231   :  { %s950_s17 = scalar_lea.hbm %s1303_s7, 512 }
 0x232   :  { %p951_p5 = scmp.ne.s32.totalorder %s1303_s7, %s950_s17  ;;  %p954_p6 = scmp.lt.u32.totalorder %s950_s17, %s1303_s7 }
 0x234   :  { %p956_p7 = pnand %p954_p6, %p951_p5 }
 0x236   :  { %959 = shalt.err (!%p956_p7)
}
 0x237   :  { %s1010_s21 = smov 64   ;;  %s1011_s22 = smov 4   ;;  %361 = vst.msk [vmem:[#allocation3 + $0x14] sm:$0xf] %vm355_vm1, %v778_v57 }
 0x238   :  { %693 = dma.vmem_to_hbm [thread:$0]  %s688_s11, 512, %s1303_s7, [#allocation6], %s1010_s21, %s1010_s21, %s1011_s22  }
 0x239   :  { %s960_s23 = scalar_lea.vmem %s1234_s13, 512  ;;  %p965_p9 = scmp.lt.s32.totalorder %s1234_s13, %s1234_s13 }
 0x23a   :  { %p961_p8 = scmp.ne.s32.totalorder %s1234_s13, %s960_s23  ;;  %p966_p10 = scmp.lt.s32.totalorder %s960_s23, %s960_s23 }
 0x23c   :  { %p967_p11 = por %p966_p10, %p965_p9 }
 0x23e   :  { %p968_p12 = pnand %p967_p11, %p961_p8 }
 0x240   :  { %971 = shalt.err (!%p968_p12)
}
 0x241   :  { %s972_s2 = scalar_lea.hbm %s1302_s6, 512 }
 0x242   :  { %p973_p13 = scmp.ne.s32.totalorder %s1302_s6, %s972_s2  ;;  %p976_p0 = scmp.lt.u32.totalorder %s972_s2, %s1302_s6 }
 0x244   :  { %p978_p1 = pnand %p976_p0, %p973_p13 }
 0x246   :  { %981 = shalt.err (!%p978_p1)
}
 0x247   :  { %681 = dma.vmem_to_hbm [thread:$0]  %s1234_s13, 512, %s1302_s6, [#allocation4], %s1010_s21, %s1010_s21, %s1011_s22   ;;  %v881_v21 = vpop.f32.mrb[8].mxu0  ;;  %v885_v58 = vpop.f32.mrb[8].mxu1 }
 0x248   :  { %v791_v59 = vpack.c.bf16 %v881_v21, %v881_v21  ;;  %v795_v60 = vpack.c.bf16 %v885_v58, %v885_v58  ;;  %v599_v61 = vpop.f32.mrb[9].mxu0  ;;  %v615_v62 = vpop.f32.mrb[9].mxu1  ;;  %s1012_s30 = smov [#allocation7]  }
 0x249   :  { %s699_s9 = sshll.u32 %s1012_s30, 4  ;;  %v789_v29 = vpack.c.bf16 %v599_v61, %v599_v61  ;;  %v793_v38 = vpack.c.bf16 %v615_v62, %v615_v62  ;;  %v882_v63 = vpop.f32.mrb[10].mxu0  ;;  %v886_v0 = vpop.f32.mrb[10].mxu1  ;;  %s700_s9 = int_to_ptr.vmem [resolvable:$true] %s699_s9 }
 0x24a   :  { %664 = vst.msk [vmem:[#allocation7 + $0x8] sm:$0xf] %vm355_vm1, %v791_v59  ;;  %668 = vst.msk [vmem:[#allocation7 + $0x18] sm:$0xf] %vm355_vm1, %v795_v60  ;;  %v792_v1 = vpack.c.bf16 %v882_v63, %v882_v63  ;;  %v796_v2 = vpack.c.bf16 %v886_v0, %v886_v0  ;;  %v602_v3 = vpop.f32.mrb[11].mxu0  ;;  %v618_v5 = vpop.f32.mrb[11].mxu1  ;;  %p987_p3 = scmp.lt.s32.totalorder %s700_s9, %s700_s9 }
 0x24b   :  { %662 = vst.msk [vmem:[#allocation7] sm:$0xf] %vm355_vm1, %v789_v29  ;;  %666 = vst.msk [vmem:[#allocation7 + $0x10] sm:$0xf] %vm355_vm1, %v793_v38  ;;  %v790_v6 = vpack.c.bf16 %v602_v3, %v602_v3  ;;  %v794_v39 = vpack.c.bf16 %v618_v5, %v618_v5  ;;  %s982_s6 = scalar_lea.vmem %s700_s9, 512 }
 0x24c   :  { %665 = vst.msk [vmem:[#allocation7 + $0xc] sm:$0xf] %vm355_vm1, %v792_v1  ;;  %669 = vst.msk [vmem:[#allocation7 + $0x1c] sm:$0xf] %vm355_vm1, %v796_v2  ;;  %p983_p2 = scmp.ne.s32.totalorder %s700_s9, %s982_s6  ;;  %p988_p4 = scmp.lt.s32.totalorder %s982_s6, %s982_s6 }
 0x24d   :  { %663 = vst.msk [vmem:[#allocation7 + $0x4] sm:$0xf] %vm355_vm1, %v790_v6  ;;  %667 = vst.msk [vmem:[#allocation7 + $0x14] sm:$0xf] %vm355_vm1, %v794_v39 }
 0x24e   :  { %p989_p5 = por %p988_p4, %p987_p3 }
 0x250   :  { %p990_p6 = pnand %p989_p5, %p983_p2 }
 0x252   :  { %993 = shalt.err (!%p990_p6)
}
 0x253   :  { %s994_s11 = scalar_lea.hbm %s1304_s8, 512 }
 0x254   :  { %p995_p7 = scmp.ne.s32.totalorder %s1304_s8, %s994_s11  ;;  %p998_p8 = scmp.lt.u32.totalorder %s994_s11, %s1304_s8 }
 0x256   :  { %p1000_p9 = pnand %p998_p8, %p995_p7 }
 0x258   :  { %1003 = shalt.err (!%p1000_p9)
}
 0x259   :  { %705 = dma.vmem_to_hbm [thread:$0]  %s700_s9, 512, %s1304_s8, [#allocation6], %s1010_s21, %s1010_s21, %s1011_s22  }
 0x25a   :  { %1004 = dma.done.wait [#allocation4], 512  }
 0x25b   :  { %1005 = vsyncadd [#allocation4], 4294966784 }
 0x25c   :  { %1006 = dma.done.wait [#allocation6], 1024  }
 0x25d   :  { %1007 = vsyncadd [#allocation6], 4294966272 }
 0x25e   :  { %715 = vsyncpa [#allocation4], 1 }
 0x25f   :  { %716 = vsyncpa [#allocation6], 1 }

</bundles_post_ra>
